<compile_context>
chip_gen: v7x
topology: tpu7x:2x2x1
jax: 0.10.0
libtpu: 0.0.40
codegen_flags: <defaults>
</compile_context>

<pallas_src>
import functools
import math

import jax
import jax.numpy as jnp
from jax.experimental import pallas as pl
from jax.experimental.pallas import tpu as pltpu


# ---------------------------------------------------------------------------
# Fused path: one kernel, whole problem VMEM-resident.
# ---------------------------------------------------------------------------
def _fused_conv_bn_kernel(x_ref, w_ref, gamma_ref, beta_ref, o_ref, *, eps):
    # x_ref: (K*C_in, L)  w_ref: (C_out, K*C_in)  gamma/beta: (C_out, 1)  o: (C_out, L)
    conv = jnp.dot(w_ref[...], x_ref[...],
                   preferred_element_type=jnp.float32)          # (C_out, L), f32
    mean = jnp.mean(conv, axis=1, keepdims=True)                # (C_out, 1)
    var = jnp.mean((conv - mean) ** 2, axis=1, keepdims=True)   # biased (training BN)
    scale = gamma_ref[...] * jax.lax.rsqrt(var + eps)
    shift = beta_ref[...] - mean * scale
    o_ref[...] = (conv * scale + shift).astype(o_ref.dtype)


# ---------------------------------------------------------------------------
# Tiled path, pass 1: conv tile + accumulate per-channel sum / sum-of-squares.
# psum/psumsq are VMEM-resident accumulators (constant output block index along
# the "arbitrary" grid axis).
# ---------------------------------------------------------------------------
def _conv_stats_kernel(x_ref, w_ref, conv_ref, psum_ref, psumsq_ref):
    j = pl.program_id(0)
    conv = jnp.dot(w_ref[...], x_ref[...],
                   preferred_element_type=jnp.float32)          # (C_out, TL), f32
    conv_ref[...] = conv

    @pl.when(j == 0)
    def _():
        psum_ref[...] = jnp.zeros_like(psum_ref)
        psumsq_ref[...] = jnp.zeros_like(psumsq_ref)

    psum_ref[...] += jnp.sum(conv, axis=1, keepdims=True)        # (C_out, 1)
    psumsq_ref[...] += jnp.sum(conv * conv, axis=1, keepdims=True)


# ---------------------------------------------------------------------------
# Tiled path, pass 2: per-channel affine (the folded BatchNorm).
# ---------------------------------------------------------------------------
def _bn_apply_kernel(conv_ref, scale_ref, shift_ref, o_ref):
    o_ref[...] = (conv_ref[...] * scale_ref[...] + shift_ref[...]).astype(o_ref.dtype)


def unit_tcn_forward(x, weight, gamma, beta, *, stride=1, eps=1e-5, block_l=None):
    """x: (N, C_in, T, V) float32 (NCHW).  weight: (C_out, C_in, K, 1)."""
    n, c_in, t, v = x.shape
    c_out, _, ksize, _ = weight.shape
    pad = (ksize - 1) // 2
    t_pad = t + 2 * pad
    t_out = (t_pad - ksize) // stride + 1
    l = t_out * n * v

    # --- wrapper glue: pad T, rearrange, im2col ---------------------------------
    x_p = jnp.pad(x, ((0, 0), (0, 0), (pad, pad), (0, 0)))      # (N, C_in, T_pad, V)
    x_t = jnp.transpose(x_p, (1, 2, 0, 3))                      # (C_in, T_pad, N, V)
    # rows indexed by (k, c_in); columns by (t_out, n, v)
    cols = [x_t[:, k:k + (t_out - 1) * stride + 1:stride] for k in range(ksize)]
    x_col = jnp.stack(cols, axis=0).reshape(ksize * c_in, l).astype(jnp.float32)

    # weight[o, c, k, 0] -> w_col[o, k*C_in + c]
    w_col = jnp.transpose(weight[..., 0], (0, 2, 1)).reshape(c_out, ksize * c_in)
    w_col = w_col.astype(jnp.float32)
    g = gamma.reshape(c_out, 1).astype(jnp.float32)
    b = beta.reshape(c_out, 1).astype(jnp.float32)
    # NOTE: the conv bias is zero-initialized in the PyTorch module and, being a
    # per-channel constant, cancels under training-mode BN, so it is omitted.

    if block_l is None:
        block_l = 2048                      # lane-axis tile (multiple of 128)

    if l <= block_l:
        # ---- fused single-kernel path (conv + stats + affine, no HBM round-trip)
        out = pl.pallas_call(
            functools.partial(_fused_conv_bn_kernel, eps=eps),
            out_shape=jax.ShapeDtypeStruct((c_out, l), jnp.float32),
            in_specs=[pl.BlockSpec(memory_space=pltpu.MemorySpace.VMEM)] * 4,
            out_specs=pl.BlockSpec(memory_space=pltpu.MemorySpace.VMEM),
        )(x_col, w_col, g, b)
    else:
        # ---- L-tiled two-pass path ------------------------------------------
        tl = max(128, (block_l // 128) * 128)
        n_l = pl.cdiv(l, tl)
        l_pad = n_l * tl
        if l_pad != l:
            # zero columns -> conv == 0 there (no bias) -> no effect on sums
            x_col = jnp.pad(x_col, ((0, 0), (0, l_pad - l)))

        conv, psum, psumsq = pl.pallas_call(
            _conv_stats_kernel,
            grid=(n_l,),
            out_shape=(jax.ShapeDtypeStruct((c_out, l_pad), jnp.float32),
                       jax.ShapeDtypeStruct((c_out, 1), jnp.float32),
                       jax.ShapeDtypeStruct((c_out, 1), jnp.float32)),
            in_specs=[pl.BlockSpec((ksize * c_in, tl), lambda j: (0, j)),
                      pl.BlockSpec((c_out, ksize * c_in), lambda j: (0, 0))],
            out_specs=(pl.BlockSpec((c_out, tl), lambda j: (0, j)),
                       pl.BlockSpec((c_out, 1), lambda j: (0, 0)),
                       pl.BlockSpec((c_out, 1), lambda j: (0, 0))),
            compiler_params=pltpu.CompilerParams(
                dimension_semantics=("arbitrary",)),
        )(x_col, w_col)

        # Tiny (C_out,)-sized finalize of the batch statistics; left to XLA.
        mean = psum[:, 0] / l
        var = jnp.maximum(psumsq[:, 0] / l - mean * mean, 0.0)   # biased variance
        scale = g[:, 0] * jax.lax.rsqrt(var + eps)
        shift = b[:, 0] - mean * scale
        scale = scale.reshape(c_out, 1)
        shift = shift.reshape(c_out, 1)

        out = pl.pallas_call(
            _bn_apply_kernel,
            grid=(n_l,),
            out_shape=jax.ShapeDtypeStruct((c_out, l_pad), jnp.float32),
            in_specs=[pl.BlockSpec((c_out, tl), lambda j: (0, j)),
                      pl.BlockSpec((c_out, 1), lambda j: (0, 0)),
                      pl.BlockSpec((c_out, 1), lambda j: (0, 0))],
            out_specs=pl.BlockSpec((c_out, tl), lambda j: (0, j)),
            compiler_params=pltpu.CompilerParams(
                dimension_semantics=("parallel",)),
        )(conv, scale, shift)

    # back to NCHW: (C_out, T_out*N*V) -> (N, C_out, T_out, V)
    out = out[:, :l].reshape(c_out, t_out, n, v).transpose(2, 0, 1, 3)
    return out.astype(x.dtype)


def _reference(x, weight, gamma, beta, *, stride=1, eps=1e-5):
    """Pure-JAX reference (conv + training-mode BN) for validation."""
    pad = (weight.shape[2] - 1) // 2
    z = jax.lax.conv_general_dilated(
        x, weight, window_strides=(stride, 1),
        padding=((pad, pad), (0, 0)),
        dimension_numbers=("NCHW", "OIHW", "NCHW"))
    mean = z.mean(axis=(0, 2, 3), keepdims=True)
    var = ((z - mean) ** 2).mean(axis=(0, 2, 3), keepdims=True)
    return gamma.reshape(1, -1, 1, 1) * (z - mean) / jnp.sqrt(var + eps) \
        + beta.reshape(1, -1, 1, 1)


if __name__ == "__main__":
    # small shapes: batch=2, in_channels=4, out_channels=8, T=16, V=16, kernel=9
    N, C_IN, C_OUT, T, V, K, STRIDE = 2, 4, 8, 16, 16, 9, 1

    key = jax.random.PRNGKey(0)
    k_x, k_w = jax.random.split(key)

    # deterministic init matching the PyTorch module's __init__:
    #   conv: kaiming_normal_(mode='fan_out') -> std = sqrt(2 / (C_out*K*1)); bias = 0
    #   bn:   weight = 1, bias = 0
    std = math.sqrt(2.0 / (C_OUT * K * 1))
    weight = jax.random.normal(k_w, (C_OUT, C_IN, K, 1), dtype=jnp.float32) * std
    gamma = jnp.ones((C_OUT,), dtype=jnp.float32)
    beta = jnp.zeros((C_OUT,), dtype=jnp.float32)

    x = jax.random.normal(k_x, (N, C_IN, T, V), dtype=jnp.float32)

    ref = jax.block_until_ready(_reference(x, weight, gamma, beta, stride=STRIDE))

    # 1) fused single-kernel path (default: whole problem fits one VMEM block)
    out_fused = jax.block_until_ready(
        unit_tcn_forward(x, weight, gamma, beta, stride=STRIDE))
    assert out_fused.shape == ref.shape == (N, C_OUT, T, V)
    assert jnp.allclose(out_fused, ref, atol=1e-2, rtol=1e-2), float(
        jnp.max(jnp.abs(out_fused - ref)))

    # 2) L-tiled two-pass path (forced with a small tile to exercise the grid)
    out_tiled = jax.block_until_ready(
        unit_tcn_forward(x, weight, gamma, beta, stride=STRIDE, block_l=128))
    assert out_tiled.shape == ref.shape
    assert jnp.allclose(out_tiled, ref, atol=1e-2, rtol=1e-2), float(
        jnp.max(jnp.abs(out_tiled - ref)))

    print("KERNEL_OK")
</pallas_src>

<mosaic_0001>
module attributes {stable_mosaic.version = 11 : i64} {
  func.func @_fused_conv_bn_kernel(%arg0: memref<36x512xf32, #tpu.memory_space<vmem>>, %arg1: memref<8x36xf32, #tpu.memory_space<vmem>>, %arg2: memref<8x1xf32, #tpu.memory_space<vmem>>, %arg3: memref<8x1xf32, #tpu.memory_space<vmem>>, %arg4: memref<8x512xf32, #tpu.memory_space<vmem>>) attributes {dimension_semantics = [], scalar_prefetch = 0 : i64, scratch_operands = 0 : i64, tpu.core_type = #tpu.core_type<tc>} {
    %c0 = arith.constant 0 : index
    %c0_0 = arith.constant 0 : index
    %0 = vector.load %arg1[%c0, %c0_0] : memref<8x36xf32, #tpu.memory_space<vmem>>, vector<8x36xf32>
    %c0_1 = arith.constant 0 : index
    %c0_2 = arith.constant 0 : index
    %1 = vector.load %arg0[%c0_1, %c0_2] : memref<36x512xf32, #tpu.memory_space<vmem>>, vector<36x512xf32>
    %cst = arith.constant dense<0.000000e+00> : vector<8x512xf32>
    %2 = tpu.matmul %0, %1, %cst {dimension_numbers = #tpu.dot_dimension_numbers<[1], [0], [0], [1], [0, 0, 1, 1], [], []>} : vector<8x36xf32>, vector<36x512xf32>, vector<8x512xf32> -> vector<8x512xf32>
    %cst_3 = arith.constant dense<0.000000e+00> : vector<8xf32>
    %3 = vector.multi_reduction <add>, %2, %cst_3 [1] : vector<8x512xf32> to vector<8xf32>
    %4 = vector.shape_cast %3 : vector<8xf32> to vector<8x1xf32>
    %cst_4 = arith.constant 5.120000e+02 : f32
    %5 = vector.broadcast %cst_4 : f32 to vector<8x1xf32>
    %6 = arith.divf %4, %5 : vector<8x1xf32>
    %7 = vector.broadcast %6 : vector<8x1xf32> to vector<8x512xf32>
    %8 = arith.subf %2, %7 : vector<8x512xf32>
    %9 = arith.mulf %8, %8 : vector<8x512xf32>
    %cst_5 = arith.constant dense<0.000000e+00> : vector<8xf32>
    %10 = vector.multi_reduction <add>, %9, %cst_5 [1] : vector<8x512xf32> to vector<8xf32>
    %11 = vector.shape_cast %10 : vector<8xf32> to vector<8x1xf32>
    %cst_6 = arith.constant 5.120000e+02 : f32
    %12 = vector.broadcast %cst_6 : f32 to vector<8x1xf32>
    %13 = arith.divf %11, %12 : vector<8x1xf32>
    %c0_7 = arith.constant 0 : index
    %c0_8 = arith.constant 0 : index
    %14 = vector.load %arg2[%c0_7, %c0_8] : memref<8x1xf32, #tpu.memory_space<vmem>>, vector<8x1xf32>
    %cst_9 = arith.constant 9.99999974E-6 : f32
    %15 = vector.broadcast %cst_9 : f32 to vector<8x1xf32>
    %16 = arith.addf %13, %15 : vector<8x1xf32>
    %17 = math.rsqrt %16 : vector<8x1xf32>
    %18 = arith.mulf %14, %17 : vector<8x1xf32>
    %c0_10 = arith.constant 0 : index
    %c0_11 = arith.constant 0 : index
    %19 = vector.load %arg3[%c0_10, %c0_11] : memref<8x1xf32, #tpu.memory_space<vmem>>, vector<8x1xf32>
    %20 = arith.mulf %6, %18 : vector<8x1xf32>
    %21 = arith.subf %19, %20 : vector<8x1xf32>
    %22 = vector.broadcast %18 : vector<8x1xf32> to vector<8x512xf32>
    %23 = arith.mulf %2, %22 : vector<8x512xf32>
    %24 = vector.broadcast %21 : vector<8x1xf32> to vector<8x512xf32>
    %25 = arith.addf %23, %24 : vector<8x512xf32>
    %c0_12 = arith.constant 0 : index
    %c0_13 = arith.constant 0 : index
    %26 = vector.load %arg4[%c0_12, %c0_13] : memref<8x512xf32, #tpu.memory_space<vmem>>, vector<8x512xf32>
    tpu.vector_store %arg4[%c0_12, %c0_13], %25 {strides = array<i32>} : memref<8x512xf32, #tpu.memory_space<vmem>>, vector<8x512xf32>,
    return
  }
}

</mosaic_0001>

<bundles_post_ra>
// kernel: tpu_custom_call.1
= control target key start
LH: loop header
LB: loop body
LE: loop exit
PB: predicated region body
PF: predicated region fallthrough
CT: control target
= control target key end

     0   :  { %9 = vsyncpa [#allocation3], 0  ;;  %s421_s0 = inlined_call_operand.hbm [shape: f32[36,512], index: 0, kind: input, shape index: {}]   ;;  %s422_s1 = inlined_call_operand.vmem [shape: f32[8,36], index: 1, kind: input, shape index: {}]   ;;  %s423_s2 = inlined_call_operand.vmem [shape: f32[8,1], index: 2, kind: input, shape index: {}]   ;;  %s424_s3 = inlined_call_operand.vmem [shape: f32[8,1], index: 3, kind: input, shape index: {}]   ;;  %s425_s4 = inlined_call_operand.hbm [shape: f32[8,512], index: 4, kind: output, shape index: {}]  }
   0x1   :  { %10 = vsyncpa [#allocation4], 0  ;;  %s357_s15 = smov [#allocation2]   ;;  %s309_s19 = scalar_lea.hbm %s421_s0, 2560 }
   0x2   :  { %s16_s16 = sshll.u32 %s357_s15, 4  ;;  %p310_p0 = scmp.ne.s32.totalorder %s421_s0, %s309_s19  ;;  %s17_s16 = int_to_ptr.vmem [resolvable:$true] %s16_s16 }
   0x3   :  { %p313_p1 = scmp.lt.u32.totalorder %s309_s19, %s421_s0 }
   0x5   :  { %p315_p2 = pnand %p313_p1, %p310_p0 }
   0x7   :  { %318 = shalt.err (!%p315_p2)
}
   0x8   :  { %s319_s24 = scalar_lea.vmem %s17_s16, 2560  ;;  %p324_p4 = scmp.lt.s32.totalorder %s17_s16, %s17_s16 }
   0x9   :  { %p320_p3 = scmp.ne.s32.totalorder %s17_s16, %s319_s24  ;;  %p325_p5 = scmp.lt.s32.totalorder %s319_s24, %s319_s24 }
   0xb   :  { %p326_p6 = por %p325_p5, %p324_p4 }
   0xd   :  { %p327_p7 = pnand %p326_p6, %p320_p3 }
   0xf   :  { %330 = shalt.err (!%p327_p7)
}
  0x10   :  { %s358_s25 = smov 512   ;;  %s359_s26 = smov 32  }
  0x11   :  { %22 = dma.hbm_to_vmem [thread:$0]  %s421_s0, 2560, %s17_s16, [#allocation3], %s358_s25, %s358_s25, %s359_s26  }
  0x12   :  { %353 = dma.done.wait [#allocation3], 2560  }
  0x13   :  { %354 = vsyncadd [#allocation3], 4294964736  ;;  %v360_v0 = vmov 0.0   ;;  %v34_v1 = vld [vmem:[#allocation2 + $0x8] sm:$0xff]  ;;  %v33_v3 = vld [vmem:[#allocation2] sm:$0xff]  ;;  %vm57_vm0 = vcmask 1043456  }
  0x14   :  { %134 = vmatprep.mubr.f32.mxu0 %v360_v0  ;;  %205 = vmatprep.mubr.f32.mxu1 %v360_v0  ;;  %v38_v2 = vld [vmem:[#allocation2 + $0x28] sm:$0xff]  ;;  %v37_v5 = vld [vmem:[#allocation2 + $0x20] sm:$0xff]  ;;  %v36_v6 = vld [vmem:[#allocation2 + $0x18] sm:$0xff]  ;;  %vm53_vm1 = vcmask 293888   ;;  %v361_v50 = vmov 0   ;;  %s362_s7 = smov [#allocation5]  }
  0x15   :  { %v283_v4 = vpack.c.bf16 %v38_v2, %v34_v1  ;;  %v40_v7 = vld [vmem:[#allocation2 + $0x38] sm:$0xff]  ;;  %v285_v8 = vpack.c.bf16 %v37_v5, %v33_v3  ;;  %v35_v10 = vld [vmem:[#allocation2 + $0x10] sm:$0xff]  ;;  %v42_v12 = vld [vmem:[#allocation2 + $0x48] sm:$0xff]  ;;  %305 = vset.pattern.permute.xlu1 %v361_v50  ;;  %306 = vset.pattern.permute.xlu0 %v361_v50  ;;  %s268_s8 = sshll.u32 %s362_s7, 4  ;;  %s269_s8 = int_to_ptr.vmem [resolvable:$true] %s268_s8 }
  0x16   :  { %v291_v9 = vpack.c.bf16 %v40_v7, %v36_v6  ;;  %v39_v11 = vld [vmem:[#allocation2 + $0x30] sm:$0xff]  ;;  %v46_v14 = vld [vmem:[#allocation2 + $0x68] sm:$0xff]  ;;  %v41_v15 = vld [vmem:[#allocation2 + $0x40] sm:$0xff]  ;;  %p336_p9 = scmp.lt.s32.totalorder %s269_s8, %s269_s8 }
  0x17   :  { %284 = vmatprep.subr.bf16.mxu0 %v283_v4  ;;  %v293_v13 = vpack.c.bf16 %v39_v11, %v35_v10  ;;  %v45_v16 = vld [vmem:[#allocation2 + $0x60] sm:$0xff]  ;;  %v287_v17 = vpack.c.bf16 %v46_v14, %v42_v12  ;;  %v44_v19 = vld [vmem:[#allocation2 + $0x58] sm:$0xff]  ;;  %v43_v21 = vld [vmem:[#allocation2 + $0x50] sm:$0xff] }
  0x18   :  { %286 = vmatpush1.bf16.msra.mxu0 %v285_v8  ;;  %292 = vmatprep.subr.bf16.mxu1 %v291_v9  ;;  %v289_v18 = vpack.c.bf16 %v45_v16, %v41_v15  ;;  %v48_v20 = vld [vmem:[#allocation2 + $0x78] sm:$0xff]  ;;  %v47_v23 = vld [vmem:[#allocation2 + $0x70] sm:$0xff]  ;;  %v50_v25 = vld [vmem:[#allocation2 + $0x88] sm:$0xf] }
  0x19   :  { %294 = vmatpush1.bf16.msra.mxu1 %v293_v13  ;;  %v295_v22 = vpack.c.bf16 %v48_v20, %v44_v19  ;;  %288 = vmatprep.subr.bf16.mxu0 %v287_v17  ;;  %v297_v24 = vpack.c.bf16 %v47_v23, %v43_v21  ;;  %v52_v26 = vld [vmem:[#allocation2 + $0x98] sm:$0xf]  ;;  %v49_v27 = vld [vmem:[#allocation2 + $0x80] sm:$0xf]  ;;  %v51_v29 = vld [vmem:[#allocation2 + $0x90] sm:$0xf] }
  0x1a   :  { %v32_v28 = vld [vmem:[%s422_s1] sm:$0xff] }
  0x1b   :  { %296 = vmatprep.subr.bf16.mxu1 %v295_v22  ;;  %v233_v54 = vld [vmem:[%s423_s2] sm:$0xff]  ;;  %s331_s2 = scalar_lea.vmem %s269_s8, 512 }
  0x1c   :  { %290 = vmatpush1.bf16.msra.mxu0 %v289_v18  ;;  %v237_v57 = vld [vmem:[%s424_s3] sm:$0xff]  ;;  %p332_p8 = scmp.ne.s32.totalorder %s269_s8, %s331_s2  ;;  %p337_p10 = scmp.lt.s32.totalorder %s331_s2, %s331_s2 }
  0x1d   :  { %298 = vmatpush1.bf16.msra.mxu1 %v297_v24  ;;  %277 = vmatprep.subr.msk.mxu0 %vm57_vm0, %v50_v25 }
  0x1e   :  { %280 = vmatprep.subr.msk.mxu1 %vm57_vm0, %v52_v26  ;;  %p338_p11 = por %p337_p10, %p336_p9 }
  0x20   :  { %278 = vmatpush1.msk.msra.mxu0 %vm57_vm0, %v49_v27  ;;  %p339_p12 = pnand %p338_p11, %p332_p8 }
  0x21   :  { %279 = vmatmul.mubr.msk.f32.vlgmr.msra.gmra.mrb[0].mxu0 %vm53_vm1, %v32_v28  ;;  %281 = vmatpush1.msk.msra.mxu1 %vm57_vm0, %v51_v29 }
  0x22   :  { %282 = vmatmul.mubr.msk.f32.vlgmr.msra.gmra.mrb[0].mxu1 %vm53_vm1, %v32_v28 }
  0xf4   :  { %v136_v30 = vpop.f32.mrb[0].mxu0 }
  0xf5   :  { %v138_v31 = vpop.f32.mrb[1].mxu0  ;;  %v207_v32 = vpop.f32.mrb[0].mxu1 }
  0xf6   :  { %v212_v33 = vadd.f32 %v138_v31, %v136_v30  ;;  %v209_v34 = vpop.f32.mrb[1].mxu1 }
  0xf8   :  { %v213_v35 = vadd.f32 %v212_v33, %v207_v32 }
  0xfa   :  { %v214_v36 = vadd.f32 %v213_v35, %v209_v34 }
  0xfc   :  { %215 = vadd.xlane.f32.xlu0 %v214_v36 }
 0x189   :  { %v216_v37 = vpop.xlane.xlu0 %215 }
 0x18a   :  { %v218_v38 = vmul.f32 0.001953125, %v216_v37 }
 0x18c   :  { %v219_v39 = vsub.f32 %v136_v30, %v218_v38  ;;  %v220_v40 = vsub.f32 %v138_v31, %v218_v38  ;;  %v221_v41 = vsub.f32 %v207_v32, %v218_v38  ;;  %v222_v42 = vsub.f32 %v209_v34, %v218_v38 }
 0x18e   :  { %v223_v43 = vmul.f32 %v219_v39, %v219_v39  ;;  %v224_v44 = vmul.f32 %v220_v40, %v220_v40  ;;  %v225_v45 = vmul.f32 %v221_v41, %v221_v41  ;;  %v226_v47 = vmul.f32 %v222_v42, %v222_v42 }
 0x190   :  { %v227_v46 = vadd.f32 %v224_v44, %v223_v43 }
 0x192   :  { %v228_v48 = vadd.f32 %v227_v46, %v225_v45 }
 0x194   :  { %v229_v49 = vadd.f32 %v228_v48, %v226_v47 }
 0x196   :  { %230 = vadd.xlane.f32.xlu0 %v229_v49 }
 0x223   :  { %v231_v51 = vpop.xlane.xlu0 %230 }
 0x224   :  { %v232_v52 = vmul.f32 0.001953125, %v231_v51 }
 0x226   :  { %v234_v53 = vadd.f32 1e-05, %v232_v52 }
 0x228   :  { %307 = vrsqrt.f32 %v234_v53 }
 0x232   :  { %v308_v55 = vpop.eup %307 }
 0x233   :  { %v236_v56 = vmul.f32 %v308_v55, %v233_v54 }
 0x235   :  { %242 = vperm.xlu1 %305, %v236_v56   ;;  %v238_v58 = vmul.f32 %v236_v56, %v218_v38 }
 0x237   :  { %v239_v59 = vsub.f32 %v237_v57, %v238_v58 }
 0x239   :  { %251 = vperm.xlu1 %305, %v239_v59  }
 0x2b4   :  { %v243_v60 = vpop.permute.xlu1 %242 }
 0x2b5   :  { %v245_v61 = vmul.f32 %v243_v60, %v136_v30  ;;  %v246_v62 = vmul.f32 %v243_v60, %v138_v31  ;;  %v247_v63 = vmul.f32 %v243_v60, %v207_v32  ;;  %v248_v0 = vmul.f32 %v243_v60, %v209_v34 }
 0x2b8   :  { %v252_v1 = vpop.permute.xlu1 %251 }
 0x2b9   :  { %v254_v2 = vadd.f32 %v252_v1, %v245_v61  ;;  %v255_v3 = vadd.f32 %v252_v1, %v246_v62  ;;  %v256_v4 = vadd.f32 %v252_v1, %v247_v63  ;;  %v257_v5 = vadd.f32 %v252_v1, %v248_v0 }
 0x2bb   :  { %258 = vst [vmem:[#allocation5] sm:$0xff] %v254_v2  ;;  %259 = vst [vmem:[#allocation5 + $0x8] sm:$0xff] %v255_v3 }
 0x2bc   :  { %260 = vst [vmem:[#allocation5 + $0x10] sm:$0xff] %v256_v4  ;;  %261 = vst [vmem:[#allocation5 + $0x18] sm:$0xff] %v257_v5 }
 0x2bd   :  { %342 = shalt.err (!%p339_p12)
}
 0x2be   :  { %s343_s10 = scalar_lea.hbm %s425_s4, 512 }
 0x2bf   :  { %p344_p13 = scmp.ne.s32.totalorder %s425_s4, %s343_s10  ;;  %p347_p0 = scmp.lt.u32.totalorder %s343_s10, %s425_s4 }
 0x2c1   :  { %p349_p1 = pnand %p347_p0, %p344_p13 }
 0x2c3   :  { %352 = shalt.err (!%p349_p1)
}
 0x2c4   :  { %271 = dma.vmem_to_hbm [thread:$0]  %s269_s8, 512, %s425_s4, [#allocation4]  }
 0x2c5   :  { %355 = dma.done.wait [#allocation4], 512  }
 0x2c6   :  { %356 = vsyncadd [#allocation4], 4294966784 }
 0x2c7   :  { %275 = vsyncpa [#allocation3], 1 }
 0x2c8   :  { %276 = vsyncpa [#allocation4], 1 }

</bundles_post_ra>
